<compile_context>
chip_gen: v5e
topology: v5e:2x2
jax: 0.10.0
libtpu: 0.0.40
codegen_flags: <defaults>
</compile_context>

<pallas_src>
import math

import jax
import jax.numpy as jnp
from jax import lax
from jax.experimental import pallas as pl
from jax.experimental.pallas import tpu as pltpu

_SQRT2_INV = 1.0 / math.sqrt(2.0)
_HALF_SQRT_2PI = 0.5 * math.sqrt(2.0 * math.pi)   # y = C*erf(z/sqrt2) + C

# Candidate lane (last-dim) widths, widest first; all multiples of 128.
_LANE_CANDIDATES = (8192, 4096, 2048, 1024, 512, 256, 128)
_MIN_GRID_STEPS = 4          # >= 2 pipelined steps per TensorCore on v7x
_VMEM_LIMIT_BYTES = 32 << 20  # explicit scoped-VMEM limit (safe on v5e..v7x)


def _transform_dist_kernel(z_ref, o_ref):
    z = z_ref[...].astype(jnp.float32)
    # Constant-folded form of 0.5*(1+erf(z/sqrt2))*sqrt(2*pi).
    y = _HALF_SQRT_2PI * lax.erf(z * _SQRT2_INV) + _HALF_SQRT_2PI
    o_ref[...] = y.astype(o_ref.dtype)


def _target_block_bytes() -> int:
    """~4 MiB blocks on v6e/v7x, ~2 MiB elsewhere (incl. unknown/interpret)."""
    try:
        kind = jax.devices()[0].device_kind.lower()
    except Exception:
        kind = ""
    if "v6" in kind or "v7" in kind:
        return 4 << 20
    return 2 << 20


def _run_slab(slab: jax.Array, block_bytes: int) -> jax.Array:
    """Run the elementwise kernel over a contiguous (rows, lane) slab."""
    rows, lane = slab.shape
    itemsize = jnp.dtype(slab.dtype).itemsize

    # Row tile sized to ~block_bytes; multiple of 32 rows so f32/bf16/int8
    # sublane packing all stay full-vreg.
    block_rows = block_bytes // (lane * itemsize)
    block_rows = max(32, (block_rows // 32) * 32)

    # Keep >= _MIN_GRID_STEPS grid steps when the slab is big enough so both
    # v7x TensorCores get work and each still has a prefetch step to overlap.
    if rows >= 32 * _MIN_GRID_STEPS:
        cap = max(32, ((rows // _MIN_GRID_STEPS) // 32) * 32)
        block_rows = min(block_rows, cap)

    if block_rows >= rows:
        block_rows = rows          # full-extent block (always legal)
        grid = (1,)
    else:
        grid = (pl.cdiv(rows, block_rows),)  # ragged last block is masked

    n_eff = rows * lane
    cost = pl.CostEstimate(
        flops=2 * n_eff,            # mul + add per element (erf counted below)
        transcendentals=n_eff,      # one erf per element
        bytes_accessed=2 * n_eff * itemsize,
    )

    return pl.pallas_call(
        _transform_dist_kernel,
        out_shape=jax.ShapeDtypeStruct((rows, lane), slab.dtype),
        grid_spec=pltpu.PrefetchScalarGridSpec(
            num_scalar_prefetch=0,
            grid=grid,
            in_specs=[pl.BlockSpec((block_rows, lane), lambda i: (i, 0))],
            out_specs=pl.BlockSpec((block_rows, lane), lambda i: (i, 0)),
        ),
        compiler_params=pltpu.CompilerParams(
            dimension_semantics=("parallel",),
            vmem_limit_bytes=_VMEM_LIMIT_BYTES,
        ),
        cost_estimate=cost,
    )(slab)


def transform_dist(z: jax.Array) -> jax.Array:
    """Pallas TPU implementation of TransformDist.forward (elementwise)."""
    orig_shape = z.shape

    # torch.erf requires a floating tensor; promote anything else to f32.
    if not jnp.issubdtype(z.dtype, jnp.floating):
        z = z.astype(jnp.float32)
    out_dtype = z.dtype

    n = math.prod(orig_shape) if orig_shape else 1
    if n == 0:
        return z.reshape(orig_shape)

    flat = z.reshape(-1)
    block_bytes = _target_block_bytes()

    lane = next((c for c in _LANE_CANDIDATES if n % c == 0), None)

    if lane is not None:
        # Hot path: metadata-only reshape into a lane-dense slab (no pad).
        slab = flat.reshape(n // lane, lane)
        return _run_slab(slab, block_bytes).reshape(orig_shape)

    # Ragged path (element count not a multiple of 128).
    n_main = (n // 128) * 128
    if n_main == 0:
        # Tiny tensor: one full-extent block; fits trivially in VMEM.
        return _run_slab(flat.reshape(1, n), block_bytes).reshape(orig_shape)

    # Stream the 128-aligned prefix through the kernel; compute the <128
    # element tail with plain jnp (avoids pad + full-output slice copies).
    lane = next(c for c in _LANE_CANDIDATES if n_main % c == 0)
    main_out = _run_slab(flat[:n_main].reshape(n_main // lane, lane), block_bytes)

    tail = flat[n_main:].astype(jnp.float32)
    tail_out = (_HALF_SQRT_2PI * lax.erf(tail * _SQRT2_INV)
                + _HALF_SQRT_2PI).astype(out_dtype)

    flat_out = jnp.concatenate([main_out.reshape(-1), tail_out])
    return flat_out.reshape(orig_shape)


def _reference(z: jax.Array) -> jax.Array:
    y = 0.5 * (1.0 + lax.erf(z / math.sqrt(2.0)))
    return y * math.sqrt(2.0 * math.pi)


if __name__ == "__main__":
    key = jax.random.PRNGKey(0)
    # NCHW input, small shape consistent with an image-like latent.
    x = jax.random.normal(key, (2, 4, 16, 16), dtype=jnp.float32)

    out = transform_dist(x)
    out = jax.block_until_ready(out)

    ref = _reference(x)
    assert out.shape == x.shape and out.dtype == x.dtype
    assert jnp.allclose(out, ref, atol=1e-5, rtol=1e-5), "mismatch vs reference"

    # Larger, lane-aligned shape (hot path with multiple grid steps).
    x2 = jax.random.normal(jax.random.PRNGKey(1), (4, 8, 64, 64), dtype=jnp.float32)
    out2 = jax.block_until_ready(transform_dist(x2))
    assert jnp.allclose(out2, _reference(x2), atol=1e-5, rtol=1e-5)

    # Tiny ragged shape (<128 elems): single full-extent block path.
    x3 = jax.random.normal(jax.random.PRNGKey(2), (3, 5, 7), dtype=jnp.float32)
    out3 = jax.block_until_ready(transform_dist(x3))
    assert jnp.allclose(out3, _reference(x3), atol=1e-5, rtol=1e-5)

    # Larger ragged shape (>=128 elems, not 128-divisible): prefix + jnp tail.
    x4 = jax.random.normal(jax.random.PRNGKey(3), (5, 67), dtype=jnp.float32)
    out4 = jax.block_until_ready(transform_dist(x4))
    assert jnp.allclose(out4, _reference(x4), atol=1e-5, rtol=1e-5)

    print("KERNEL_OK")
</pallas_src>

<mosaic_0001>
module attributes {stable_mosaic.version = 11 : i64} {
  func.func @_transform_dist_kernel(%arg0: i32, %arg1: memref<1x2048xf32, #tpu.memory_space<vmem>>, %arg2: memref<1x2048xf32, #tpu.memory_space<vmem>>) attributes {dimension_semantics = [#tpu.dimension_semantics<parallel>], iteration_bounds = array<i64: 1>, scalar_prefetch = 0 : i64, scratch_operands = 0 : i64, tpu.core_type = #tpu.core_type<tc>, window_params = [{transform_indices = @transform_0, window_bounds = array<i64: 1, 2048>}, {transform_indices = @transform_1, window_bounds = array<i64: 1, 2048>}]} {
    %c0 = arith.constant 0 : index
    %c0_0 = arith.constant 0 : index
    %0 = vector.load %arg1[%c0, %c0_0] : memref<1x2048xf32, #tpu.memory_space<vmem>>, vector<1x2048xf32>
    %cst = arith.constant 0.707106769 : f32
    %1 = vector.broadcast %cst : f32 to vector<1x2048xf32>
    %2 = arith.mulf %0, %1 : vector<1x2048xf32>
    %3 = math.erf %2 : vector<1x2048xf32>
    %cst_1 = arith.constant 1.25331414 : f32
    %4 = vector.broadcast %cst_1 : f32 to vector<1x2048xf32>
    %5 = arith.mulf %4, %3 : vector<1x2048xf32>
    %cst_2 = arith.constant 1.25331414 : f32
    %6 = vector.broadcast %cst_2 : f32 to vector<1x2048xf32>
    %7 = arith.addf %5, %6 : vector<1x2048xf32>
    %c0_3 = arith.constant 0 : index
    %c0_4 = arith.constant 0 : index
    %8 = vector.load %arg2[%c0_3, %c0_4] : memref<1x2048xf32, #tpu.memory_space<vmem>>, vector<1x2048xf32>
    tpu.vector_store %arg2[%c0_3, %c0_4], %7 {strides = array<i32>} : memref<1x2048xf32, #tpu.memory_space<vmem>>, vector<1x2048xf32>,
    return
  }
  func.func @transform_0(%arg0: i32) -> (i32, i32) {
    %c0_i32 = arith.constant 0 : i32
    %c0_i32_0 = arith.constant 0 : i32
    return %arg0, %c0_i32 : i32, i32
  }
  func.func @transform_1(%arg0: i32) -> (i32, i32) {
    %c0_i32 = arith.constant 0 : i32
    %c0_i32_0 = arith.constant 0 : i32
    return %arg0, %c0_i32 : i32, i32
  }
}

</mosaic_0001>

<bundles_post_ra>
// kernel: tpu_custom_call.1
= control target key start
LH: loop header
LB: loop body
LE: loop exit
PB: predicated region body
PF: predicated region fallthrough
CT: control target
= control target key end

     0   :  { %6 = vsyncpa [#allocation3], 0  ;;  %s218_s0 = inlined_call_operand.hbm [shape: f32[1,2048], index: 0, kind: input, shape index: {}]   ;;  %s219_s1 = inlined_call_operand.hbm [shape: f32[1,2048], index: 1, kind: output, shape index: {}]  }
   0x1   :  { %7 = vsyncpa [#allocation4], 0  ;;  %s13_s8 = sshll.u32 %s218_s0, 4  ;;  %s190_s9 = smov [#allocation2]   ;;  %s14_s8 = int_to_ptr.hbm [resolvable:$true] %s13_s8 }
   0x2   :  { %s15_s10 = sshll.u32 %s190_s9, 4  ;;  %s16_s10 = int_to_ptr.vmem [resolvable:$true] %s15_s10 }
   0x3   :  { %18 = dma.hbm_to_vmem [thread:$0]  %s14_s8, 256, %s16_s10, [#allocation3]  }
   0x4   :  { %186 = dma.done.wait [#allocation3], 256  }
   0x5   :  { %187 = vsyncadd [#allocation3], 4294967040  ;;  %v23_v0 = vld [vmem:[#allocation2] sm:$0xff]  ;;  %v24_v1 = vld [vmem:[#allocation2 + $0x8] sm:$0xff]  ;;  %s191_s0 = smov [#allocation5]   ;;  %s120_s14 = sshll.u32 %s219_s1, 4  ;;  %s121_s14 = int_to_ptr.hbm [resolvable:$true] %s120_s14 }
   0x6   :  { %v205_v2 = vmul.f32 0.70710677, %v23_v0  ;;  %v207_v3 = vmul.f32 0.70710677, %v24_v1  ;;  %s118_s11 = sshll.u32 %s191_s0, 4  ;;  %s119_s11 = int_to_ptr.vmem [resolvable:$true] %s118_s11 }
   0x8   :  { %v27_v4 = vmul.f32 %v205_v2, %v205_v2  ;;  %v67_v5 = vmul.f32 %v207_v3, %v207_v3 }
   0xa   :  { %v28_v6 = vmin.f32 %v27_v4, 16.0  ;;  %v68_v7 = vmin.f32 %v67_v5, 16.0 }
   0xc   :  { %v29_v8 = vmul.f32 2.1237322e-06, %v28_v6  ;;  %v40_v9 = vmul.f32 3.8918573e-05, %v28_v6  ;;  %v69_v10 = vmul.f32 2.1237322e-06, %v68_v7 }
   0xd   :  { %v80_v11 = vmul.f32 3.8918573e-05, %v68_v7 }
   0xe   :  { %v30_v12 = vadd.f32 0.00028619796, %v29_v8  ;;  %v41_v13 = vadd.f32 0.001143296, %v40_v9  ;;  %v70_v14 = vadd.f32 0.00028619796, %v69_v10 }
   0xf   :  { %v81_v15 = vadd.f32 0.001143296, %v80_v11 }
  0x10   :  { %v31_v16 = vmul.f32 %v30_v12, %v28_v6  ;;  %v42_v17 = vmul.f32 %v41_v13, %v28_v6  ;;  %v71_v18 = vmul.f32 %v70_v14, %v68_v7 }
  0x11   :  { %v82_v19 = vmul.f32 %v81_v15, %v68_v7 }
  0x12   :  { %v32_v20 = vadd.f32 0.0036580483, %v31_v16  ;;  %v43_v21 = vadd.f32 0.014752088, %v42_v17  ;;  %v72_v22 = vadd.f32 0.0036580483, %v71_v18 }
  0x13   :  { %v83_v23 = vadd.f32 0.014752088, %v82_v19 }
  0x14   :  { %v33_v24 = vmul.f32 %v32_v20, %v28_v6  ;;  %v44_v25 = vmul.f32 %v43_v21, %v28_v6  ;;  %v73_v26 = vmul.f32 %v72_v22, %v68_v7 }
  0x15   :  { %v84_v27 = vmul.f32 %v83_v23, %v68_v7 }
  0x16   :  { %v45_v28 = vadd.f32 0.112945676, %v44_v25  ;;  %v34_v29 = vadd.f32 0.05243302, %v33_v24  ;;  %v74_v32 = vadd.f32 0.05243302, %v73_v26 }
  0x17   :  { %v85_v30 = vadd.f32 0.112945676, %v84_v27 }
  0x18   :  { %v46_v31 = vmul.f32 %v45_v28, %v28_v6  ;;  %v35_v35 = vmul.f32 %v34_v29, %v28_v6  ;;  %v75_v38 = vmul.f32 %v74_v32, %v68_v7 }
  0x19   :  { %v86_v33 = vmul.f32 %v85_v30, %v68_v7 }
  0x1a   :  { %v47_v34 = vadd.f32 0.4994258, %v46_v31  ;;  %v36_v41 = vadd.f32 0.18741608, %v35_v35  ;;  %v76_v43 = vadd.f32 0.18741608, %v75_v38 }
  0x1b   :  { %v87_v36 = vadd.f32 0.4994258, %v86_v33 }
  0x1c   :  { %v48_v37 = vmul.f32 %v47_v34, %v28_v6  ;;  %v37_v44 = vmul.f32 %v36_v41, %v28_v6  ;;  %v77_v45 = vmul.f32 %v76_v43, %v68_v7 }
  0x1d   :  { %v88_v39 = vmul.f32 %v87_v36, %v68_v7 }
  0x1e   :  { %v49_v40 = vadd.f32 1.0, %v48_v37  ;;  %v38_v48 = vadd.f32 1.1283791, %v37_v44  ;;  %v78_v51 = vadd.f32 1.1283791, %v77_v45 }
  0x1f   :  { %v89_v42 = vadd.f32 1.0, %v88_v39 }
  0x20   :  { %134 = vrcp.f32 %v49_v40  ;;  %vm55_vm0 = vweird.f32 %v49_v40  ;;  %v61_v50 = vand.u32 2147483648, %v49_v40  ;;  %v59_v54 = vand.u32 2147483647, %v49_v40 }
  0x21   :  { %136 = vrcp.f32 %v89_v42  ;;  %v101_v55 = vand.u32 2147483648, %v89_v42  ;;  %vm95_vm2 = vweird.f32 %v89_v42  ;;  %v99_v57 = vand.u32 2147483647, %v89_v42 }
  0x22   :  { %v62_v59 = vor.u32 1.1754944e-38, %v61_v50  ;;  %v39_v61 = vmul.f32 %v38_v48, %v205_v2  ;;  %vm60_vm5 = vcmp.eq.f32.partialorder %v59_v54, 8.507059e+37  ;;  %v79_v0 = vmul.f32 %v78_v51, %v207_v3 }
  0x23   :  { %v102_v63 = vor.u32 1.1754944e-38, %v101_v55  ;;  %vm100_vm7 = vcmp.eq.f32.partialorder %v99_v57, 8.507059e+37 }
  0x26   :  { %v135_v46 = vpop.eup %134 }
  0x27   :  { %v137_v47 = vpop.eup %136  ;;  %v51_v49 = vmul.f32 %v135_v46, %v49_v40  ;;  %vm56_vm1 = vweird.f32 %v135_v46 }
  0x28   :  { %v91_v52 = vmul.f32 %v137_v47, %v89_v42  ;;  %vm96_vm3 = vweird.f32 %v137_v47  ;;  %vm57_vm4 = vmor %vm55_vm0, %vm56_vm1 }
  0x29   :  { %v52_v53 = vsub.f32 1.0, %v51_v49  ;;  %vm97_vm6 = vmor %vm95_vm2, %vm96_vm3 }
  0x2a   :  { %v92_v56 = vsub.f32 1.0, %v91_v52 }
  0x2b   :  { %v53_v58 = vmul.f32 %v135_v46, %v52_v53 }
  0x2c   :  { %v93_v60 = vmul.f32 %v137_v47, %v92_v56 }
  0x2d   :  { %v54_v62 = vadd.f32 %v135_v46, %v53_v58 }
  0x2e   :  { %v94_v1 = vadd.f32 %v137_v47, %v93_v60 }
  0x2f   :  { %v58_v4 = vsel %vm57_vm4, %v135_v46, %v54_v62 }
  0x30   :  { %v63_v5 = vsel %vm60_vm5, %v62_v59, %v58_v4  ;;  %v98_v6 = vsel %vm97_vm6, %v137_v47, %v94_v1 }
  0x31   :  { %v64_v7 = vmul.f32 %v63_v5, %v39_v61  ;;  %v103_v8 = vsel %vm100_vm7, %v102_v63, %v98_v6 }
  0x32   :  { %v104_v9 = vmul.f32 %v103_v8, %v79_v0 }
  0x33   :  { %v130_v10 = vclamps-f32 %v64_v7, 1.0 }
  0x34   :  { %v131_v11 = vclamps-f32 %v104_v9, 1.0 }
  0x35   :  { %v107_v12 = vmul.f32 1.2533141, %v130_v10 }
  0x36   :  { %v108_v2 = vmul.f32 1.2533141, %v131_v11 }
  0x37   :  { %v109_v13 = vadd.f32 1.2533141, %v107_v12 }
  0x38   :  { %v110_v3 = vadd.f32 1.2533141, %v108_v2 }
  0x39   :  { %111 = vst [vmem:[#allocation5] sm:$0xff] %v109_v13 }
  0x3a   :  { %112 = vst [vmem:[#allocation5 + $0x8] sm:$0xff] %v110_v3 }
  0x3b   :  { %123 = dma.vmem_to_hbm [thread:$0]  %s119_s11, 256, %s121_s14, [#allocation4]  }
  0x3c   :  { %188 = dma.done.wait [#allocation4], 256  }
  0x3d   :  { %189 = vsyncadd [#allocation4], 4294967040 }
  0x3e   :  { %128 = vsyncpa [#allocation3], 1 }
  0x3f   :  { %129 = vsyncpa [#allocation4], 1 }

</bundles_post_ra>
